<compile_context>
chip_gen: v6e
topology: v6e:2x2x1
jax: 0.10.0
libtpu: 0.0.40
codegen_flags: <defaults>
</compile_context>

<pallas_src>
import numpy as np

import jax
import jax.numpy as jnp
from jax.experimental import pallas as pl
from jax.experimental.pallas import tpu as pltpu


def _aux_loss_kernel(x_ref, xp_ref, wband_ref, bias_ref, out_ref):
    """GB lane-dense image groups per step: 3x3 SAME conv via one matmul + SSE."""
    GB, H, L = x_ref.shape
    x = x_ref[...]                                            # (GB, H, L) f32

    # Row halo built in-register (no wrapper jnp.pad / extra HBM pass):
    # per-group shifted rows h-1 / h+1 with zero boundary rows (SAME along H).
    zrow = jnp.zeros((GB, 1, L), jnp.float32)
    x_up = jnp.concatenate([zrow, x[:, :H - 1, :]], axis=1)   # rows h-1
    x_dn = jnp.concatenate([x[:, 1:, :], zrow], axis=1)       # rows h+1

    # im2row along lanes: [h-1 | h | h+1] -> (GB*H, 3L).  GB groups are
    # stacked into the matmul M dimension (MXU rows); H multiple of 8 keeps
    # the (GB,H,3L)->(GB*H,3L) collapse layout-free.
    x_cat = jnp.concatenate([x_up, x, x_dn], axis=-1).reshape(GB * H, 3 * L)

    # One lane-dense MXU matmul against the banded conv matrix + bias row.
    x_reference = jnp.dot(x_cat, wband_ref[...],
                          preferred_element_type=jnp.float32)  # (GB*H, L)
    x_reference = x_reference + bias_ref[...]                  # (1, L) broadcast

    # Partial sum of squared error for this step (reduced/scaled in wrapper).
    diff = x_reference - xp_ref[...].reshape(GB * H, L)
    out_ref[...] = jnp.full((1, 1), jnp.sum(diff * diff), jnp.float32)


def _band_gather_spec(C, W, G):
    """Static index/mask expanding (3,3,C,C) conv weights into the banded
    (3, L, L) matrix acting on lane-dense (.., w, c) slabs, L = G*W*C.
    SAME padding along W is encoded by omitting out-of-range taps."""
    L = G * W * C
    idx = np.zeros((3, L, L), dtype=np.int32)
    msk = np.zeros((3, L, L), dtype=np.float32)
    for dy in range(3):
        for g in range(G):
            base = g * W * C
            for w_out in range(W):
                for dx in range(3):
                    w_in = w_out + dx - 1
                    if not 0 <= w_in < W:
                        continue        # tap falls outside the row -> zero pad
                    for cin in range(C):
                        for cout in range(C):
                            j_in = base + w_in * C + cin
                            j_out = base + w_out * C + cout
                            idx[dy, j_in, j_out] = ((dy * 3 + dx) * C + cin) * C + cout
                            msk[dy, j_in, j_out] = 1.0
    return idx, msk


def aux_loss_forward(x_nchw, x_processed_nchw, w_hwio, bias, weight=0.5):
    """weight * MSE(conv3x3_same(x) + b, x_processed); hot path in Pallas."""
    x = x_nchw.astype(jnp.float32)
    xp = x_processed_nchw.astype(jnp.float32)
    N, C, H, W = x.shape

    # Lane-group packing: G images per 128-lane group, L = G*W*C (<=128 here).
    G = max(1, min(N, 128 // (W * C))) if W * C <= 128 else 1
    while N % G:
        G -= 1
    NG = N // G
    L = G * W * C                       # = 128 for the test shapes

    # M-stacking: GB lane-groups per grid step so GB*H >= 256 (MXU rows on
    # v6e/v7x; >=128 on v5e) and per-step overhead is amortized.
    GB = max(1, min(NG, -(-256 // H)))
    while NG % GB:
        GB -= 1
    NB = NG // GB                       # grid steps

    # Single layout pass per tensor (one XLA copy): NCHW -> (NG, H, L) slab,
    # lane j = g_in_group*W*C + w*C + c.  No jnp.pad: row halo is in-kernel.
    def to_slab(t):
        t = t.reshape(NG, G, C, H, W)
        t = t.transpose(0, 3, 1, 4, 2)          # (NG, H, G, W, C)
        return t.reshape(NG, H, L)

    x_slab = to_slab(x)
    xp_slab = to_slab(xp)

    # Static weight repack: banded (3L, L) conv matrix + (1, L) bias lane row.
    idx, msk = _band_gather_spec(C, W, G)
    w_flat = w_hwio.astype(jnp.float32).reshape(-1)
    w_band = (w_flat[idx] * msk).reshape(3 * L, L)
    bias_row = jnp.tile(bias.astype(jnp.float32), G * W).reshape(1, L)

    # CORE_PARALLEL actually shards grid steps across v7x's two TensorCores
    # (plain "parallel" has no codegen effect); needs NB >= 2 to matter.
    dim_semantics = ((pltpu.CORE_PARALLEL,) if NB > 1 else ("arbitrary",))

    cost = pl.CostEstimate(
        flops=2 * NB * (GB * H) * (3 * L) * L,
        transcendentals=0,
        bytes_accessed=4 * (2 * NG * H * L + 3 * L * L + L + NB),
    )

    partial_sse = pl.pallas_call(
        _aux_loss_kernel,
        out_shape=jax.ShapeDtypeStruct((NB, 1), jnp.float32),
        grid_spec=pltpu.PrefetchScalarGridSpec(
            num_scalar_prefetch=0,
            grid=(NB,),
            in_specs=[
                pl.BlockSpec((GB, H, L), lambda b: (b, 0, 0)),      # x slab (GB groups)
                pl.BlockSpec((GB, H, L), lambda b: (b, 0, 0)),      # processed slab
                pl.BlockSpec((3 * L, L), lambda b: (0, 0)),         # banded conv weights
                pl.BlockSpec((1, L), lambda b: (0, 0)),             # bias lane row
            ],
            out_specs=pl.BlockSpec((1, 1), lambda b: (b, 0)),       # per-step partial SSE
        ),
        compiler_params=pltpu.CompilerParams(
            dimension_semantics=dim_semantics),
        cost_estimate=cost,
    )(x_slab, xp_slab, w_band, bias_row)

    # Final reduction + mean + aux-loss weight in the wrapper (independent
    # per-step partials, no carried accumulator).
    return weight * jnp.sum(partial_sse) / (N * C * H * W)


def _reference(x_nchw, x_processed_nchw, w_hwio, bias, weight):
    """Plain-JAX reference of the same computation (sanity check)."""
    w_oihw = jnp.transpose(w_hwio, (3, 2, 0, 1))
    conv = jax.lax.conv_general_dilated(
        x_nchw, w_oihw, window_strides=(1, 1), padding="SAME",
        dimension_numbers=("NCHW", "OIHW", "NCHW"))
    conv = conv + bias.reshape(1, -1, 1, 1)
    return weight * jnp.mean((conv - x_processed_nchw) ** 2)


if __name__ == "__main__":
    key = jax.random.PRNGKey(0)
    k_x, k_w, k_b = jax.random.split(key, 3)

    N, C, H, W = 2, 4, 16, 16
    weight = 0.5

    # Deterministic inputs / parameters.
    x = jax.random.normal(k_x, (N, C, H, W), dtype=jnp.float32)
    conv_w = 0.1 * jax.random.normal(k_w, (3, 3, C, C), dtype=jnp.float32)  # HWIO
    conv_b = 0.05 * jax.random.normal(k_b, (C,), dtype=jnp.float32)

    # processor_adv.buffer['processed_rgb']: simulated adversarial output (glue).
    # TODO(synk): AuxLoss's generic loss_aux / processor callables and the
    # registered-buffer read are instantiated concretely (3x3 conv + MSE).
    x_processed = jnp.tanh(x) * 0.8 + 0.05

    loss = aux_loss_forward(x, x_processed, conv_w, conv_b, weight=weight)
    loss = jax.block_until_ready(loss)

    ref = _reference(x, x_processed, conv_w, conv_b, weight)
    assert jnp.allclose(loss, ref, rtol=1e-4, atol=1e-5), (loss, ref)

    print("KERNEL_OK")
</pallas_src>

<mosaic_0001>
module attributes {stable_mosaic.version = 11 : i64} {
  func.func @_aux_loss_kernel(%arg0: i32, %arg1: memref<1x16x128xf32, #tpu.memory_space<vmem>>, %arg2: memref<1x16x128xf32, #tpu.memory_space<vmem>>, %arg3: memref<384x128xf32, #tpu.memory_space<vmem>>, %arg4: memref<1x128xf32, #tpu.memory_space<vmem>>, %arg5: memref<1x1xf32, #tpu.memory_space<vmem>>) attributes {dimension_semantics = [#tpu.dimension_semantics<arbitrary>], iteration_bounds = array<i64: 1>, scalar_prefetch = 0 : i64, scratch_operands = 0 : i64, tpu.core_type = #tpu.core_type<tc>, window_params = [{transform_indices = @transform_0, window_bounds = array<i64: 1, 16, 128>}, {transform_indices = @transform_1, window_bounds = array<i64: 1, 16, 128>}, {pipeline_mode = #tpu.pipeline_mode<synchronous>, transform_indices = @transform_2, window_bounds = array<i64: 384, 128>}, {pipeline_mode = #tpu.pipeline_mode<synchronous>, transform_indices = @transform_3, window_bounds = array<i64: 1, 128>}, {transform_indices = @transform_4, window_bounds = array<i64: 1, 1>}]} {
    %c0 = arith.constant 0 : index
    %c0_0 = arith.constant 0 : index
    %c0_1 = arith.constant 0 : index
    %0 = vector.load %arg1[%c0, %c0_0, %c0_1] : memref<1x16x128xf32, #tpu.memory_space<vmem>>, vector<1x16x128xf32>
    %cst = arith.constant 0.000000e+00 : f32
    %1 = vector.broadcast %cst : f32 to vector<1x1x128xf32>
    %2 = vector.extract_strided_slice %0 {offsets = [0, 0, 0], sizes = [1, 15, 128], strides = [1, 1, 1]} : vector<1x16x128xf32> to vector<1x15x128xf32>
    %3 = tpu.concatenate %1, %2 in 1 : vector<1x1x128xf32>, vector<1x15x128xf32> -> vector<1x16x128xf32>
    %4 = vector.extract_strided_slice %0 {offsets = [0, 1, 0], sizes = [1, 15, 128], strides = [1, 1, 1]} : vector<1x16x128xf32> to vector<1x15x128xf32>
    %5 = tpu.concatenate %4, %1 in 1 : vector<1x15x128xf32>, vector<1x1x128xf32> -> vector<1x16x128xf32>
    %6 = tpu.concatenate %3, %0, %5 in 2 : vector<1x16x128xf32>, vector<1x16x128xf32>, vector<1x16x128xf32> -> vector<1x16x384xf32>
    %7 = vector.shape_cast %6 : vector<1x16x384xf32> to vector<16x384xf32>
    %c0_2 = arith.constant 0 : index
    %c0_3 = arith.constant 0 : index
    %8 = vector.load %arg3[%c0_2, %c0_3] : memref<384x128xf32, #tpu.memory_space<vmem>>, vector<384x128xf32>
    %cst_4 = arith.constant dense<0.000000e+00> : vector<16x128xf32>
    %9 = tpu.matmul %7, %8, %cst_4 {dimension_numbers = #tpu.dot_dimension_numbers<[1], [0], [0], [1], [0, 0, 1, 1], [], []>} : vector<16x384xf32>, vector<384x128xf32>, vector<16x128xf32> -> vector<16x128xf32>
    %c0_5 = arith.constant 0 : index
    %c0_6 = arith.constant 0 : index
    %10 = vector.load %arg4[%c0_5, %c0_6] : memref<1x128xf32, #tpu.memory_space<vmem>>, vector<1x128xf32>
    %11 = vector.broadcast %10 : vector<1x128xf32> to vector<16x128xf32>
    %12 = arith.addf %9, %11 : vector<16x128xf32>
    %c0_7 = arith.constant 0 : index
    %c0_8 = arith.constant 0 : index
    %c0_9 = arith.constant 0 : index
    %13 = vector.load %arg2[%c0_7, %c0_8, %c0_9] : memref<1x16x128xf32, #tpu.memory_space<vmem>>, vector<1x16x128xf32>
    %14 = vector.shape_cast %13 : vector<1x16x128xf32> to vector<16x128xf32>
    %15 = arith.subf %12, %14 : vector<16x128xf32>
    %16 = arith.mulf %15, %15 : vector<16x128xf32>
    %17 = vector.shape_cast %16 : vector<16x128xf32> to vector<1x16x128xf32>
    %cst_10 = arith.constant dense<0.000000e+00> : vector<1xf32>
    %18 = vector.multi_reduction <add>, %17, %cst_10 [1, 2] : vector<1x16x128xf32> to vector<1xf32>
    %19 = vector.shape_cast %18 : vector<1xf32> to vector<1x1x1xf32>
    %20 = vector.extract %19[0, 0, 0] : f32 from vector<1x1x1xf32>
    %21 = vector.broadcast %20 : f32 to vector<1x1xf32>
    %c0_11 = arith.constant 0 : index
    %c0_12 = arith.constant 0 : index
    %22 = vector.load %arg5[%c0_11, %c0_12] : memref<1x1xf32, #tpu.memory_space<vmem>>, vector<1x1xf32>
    tpu.vector_store %arg5[%c0_11, %c0_12], %21 {strides = array<i32>} : memref<1x1xf32, #tpu.memory_space<vmem>>, vector<1x1xf32>,
    return
  }
  func.func @transform_0(%arg0: i32) -> (i32, i32, i32) {
    %c0_i32 = arith.constant 0 : i32
    %c0_i32_0 = arith.constant 0 : i32
    %c0_i32_1 = arith.constant 0 : i32
    return %arg0, %c0_i32, %c0_i32_0 : i32, i32, i32
  }
  func.func @transform_1(%arg0: i32) -> (i32, i32, i32) {
    %c0_i32 = arith.constant 0 : i32
    %c0_i32_0 = arith.constant 0 : i32
    %c0_i32_1 = arith.constant 0 : i32
    return %arg0, %c0_i32, %c0_i32_0 : i32, i32, i32
  }
  func.func @transform_2(%arg0: i32) -> (i32, i32) {
    %c0_i32 = arith.constant 0 : i32
    %c0_i32_0 = arith.constant 0 : i32
    %c0_i32_1 = arith.constant 0 : i32
    return %c0_i32, %c0_i32_0 : i32, i32
  }
  func.func @transform_3(%arg0: i32) -> (i32, i32) {
    %c0_i32 = arith.constant 0 : i32
    %c0_i32_0 = arith.constant 0 : i32
    %c0_i32_1 = arith.constant 0 : i32
    return %c0_i32, %c0_i32_0 : i32, i32
  }
  func.func @transform_4(%arg0: i32) -> (i32, i32) {
    %c0_i32 = arith.constant 0 : i32
    %c0_i32_0 = arith.constant 0 : i32
    return %arg0, %c0_i32 : i32, i32
  }
}

</mosaic_0001>

<bundles_post_ra>
// kernel: tpu_custom_call.1
= control target key start
LH: loop header
LB: loop body
LE: loop exit
PB: predicated region body
PF: predicated region fallthrough
CT: control target
= control target key end

     0   :  { %9 = vsyncpa [#allocation3], 0  ;;  %s556_s0 = inlined_call_operand.hbm [shape: f32[1,16,128], index: 0, kind: input, shape index: {}]   ;;  %s557_s1 = inlined_call_operand.hbm [shape: f32[1,16,128], index: 1, kind: input, shape index: {}]   ;;  %s558_s2 = inlined_call_operand.hbm [shape: f32[384,128], index: 2, kind: input, shape index: {}]   ;;  %s559_s3 = inlined_call_operand.vmem [shape: f32[1,128], index: 3, kind: input, shape index: {}]   ;;  %s560_s4 = inlined_call_operand.hbm [shape: f32[1,1], index: 4, kind: output, shape index: {}]  }
   0x1   :  { %10 = vsyncpa [#allocation6], 0 }
   0x2   :  { %11 = vsyncpa [#allocation4], 0  ;;  %s506_s15 = smov [#allocation5]   ;;  %s507_s17 = smov [#allocation2]  }
   0x3   :  { %s29_s16 = sshll.u32 %s506_s15, 4  ;;  %s17_s18 = sshll.u32 %s507_s17, 4  ;;  %s30_s16 = int_to_ptr.vmem [resolvable:$true] %s29_s16  ;;  %s18_s18 = int_to_ptr.vmem [resolvable:$true] %s17_s18 }
   0x4   :  { %s428_s19 = scalar_lea.vmem %s30_s16, 256  ;;  %p433_p1 = scmp.lt.s32.totalorder %s30_s16, %s30_s16 }
   0x5   :  { %p429_p0 = scmp.ne.s32.totalorder %s30_s16, %s428_s19  ;;  %p434_p2 = scmp.lt.s32.totalorder %s428_s19, %s428_s19 }
   0x7   :  { %p435_p3 = por %p434_p2, %p433_p1 }
   0x9   :  { %p436_p4 = pnand %p435_p3, %p429_p0 }
   0xb   :  { %439 = shalt.err (!%p436_p4)
}
   0xc   :  { %s508_s20 = smov 128   ;;  %s509_s21 = smov 8  }
   0xd   :  { %35 = dma.hbm_to_vmem [thread:$0]  %s557_s1, 256, %s30_s16, [#allocation6], %s508_s20, %s508_s20, %s509_s21  }
   0xe   :  { %s448_s24 = scalar_lea.vmem %s18_s18, 256  ;;  %p453_p6 = scmp.lt.s32.totalorder %s18_s18, %s18_s18 }
   0xf   :  { %p449_p5 = scmp.ne.s32.totalorder %s18_s18, %s448_s24  ;;  %p454_p7 = scmp.lt.s32.totalorder %s448_s24, %s448_s24 }
  0x11   :  { %p455_p8 = por %p454_p7, %p453_p6 }
  0x13   :  { %p456_p9 = pnand %p455_p8, %p449_p5 }
  0x15   :  { %459 = shalt.err (!%p456_p9)
}
  0x16   :  { %23 = dma.hbm_to_vmem [thread:$0]  %s556_s0, 256, %s18_s18, [#allocation3], %s508_s20, %s508_s20, %s509_s21  }
  0x17   :  { %s510_s27 = smov [#allocation7]  }
  0x18   :  { %s41_s28 = sshll.u32 %s510_s27, 4  ;;  %s42_s28 = int_to_ptr.vmem [resolvable:$true] %s41_s28 }
  0x19   :  { %s468_s29 = scalar_lea.vmem %s42_s28, 6144  ;;  %p473_p11 = scmp.lt.s32.totalorder %s42_s28, %s42_s28 }
  0x1a   :  { %p469_p10 = scmp.ne.s32.totalorder %s42_s28, %s468_s29  ;;  %p474_p12 = scmp.lt.s32.totalorder %s468_s29, %s468_s29 }
  0x1c   :  { %p475_p13 = por %p474_p12, %p473_p11 }
  0x1e   :  { %p476_p0 = pnand %p475_p13, %p469_p10 }
  0x20   :  { %479 = shalt.err (!%p476_p0)
}
  0x21   :  { %47 = dma.hbm_to_vmem [thread:$0]  %s558_s2, 6144, %s42_s28, [#allocation6], %s508_s20, %s508_s20, %s509_s21  }
  0x22   :  { %500 = dma.done.wait [#allocation3], 256  }
  0x23   :  { %501 = vsyncadd [#allocation3], 4294967040 }
  0x24   :  { %502 = dma.done.wait [#allocation6], 6400  }
  0x25   :  { %503 = vsyncadd [#allocation6], 4294960896  ;;  %v108_v0 = vld [vmem:[#allocation7 + $0xf8] sm:$0xff]  ;;  %v107_v2 = vld [vmem:[#allocation7 + $0xf0] sm:$0xff]  ;;  %vm63_vm0 = vcmask 1040384   ;;  %vm70_vm1 = vcmask 1046528  }
  0x26   :  { %v92_v1 = vld [vmem:[#allocation7 + $0x78] sm:$0xff]  ;;  %321 = vmatprep.subr.mxu0 %v108_v0  ;;  %v91_v3 = vld [vmem:[#allocation7 + $0x70] sm:$0xff]  ;;  %v106_v5 = vld [vmem:[#allocation7 + $0xe8] sm:$0xff]  ;;  %vm299_vm3 = vcmask 0  }
  0x27   :  { %v124_v4 = vld [vmem:[#allocation7 + $0x178] sm:$0xff]  ;;  %322 = vmatpush3.msra.mxu0 %v92_v1  ;;  %v123_v6 = vld [vmem:[#allocation7 + $0x170] sm:$0xff]  ;;  %v90_v7 = vld [vmem:[#allocation7 + $0x68] sm:$0xff] }
  0x28   :  { %377 = vmatprep.subr.mxu1 %v124_v4  ;;  %323 = vmatprep.subr.mxu0 %v107_v2  ;;  %v122_v8 = vld [vmem:[#allocation7 + $0x168] sm:$0xff]  ;;  %v105_v9 = vld [vmem:[#allocation7 + $0xe0] sm:$0xff]  ;;  %v104_v12 = vld [vmem:[#allocation7 + $0xd8] sm:$0xff] }
  0x29   :  { %378 = vmatpush3.msra.mxu1 %v124_v4  ;;  %324 = vmatpush3.msra.mxu0 %v91_v3  ;;  %v89_v10 = vld [vmem:[#allocation7 + $0x60] sm:$0xff]  ;;  %v88_v13 = vld [vmem:[#allocation7 + $0x58] sm:$0xff]  ;;  %v103_v15 = vld [vmem:[#allocation7 + $0xd0] sm:$0xff] }
  0x2a   :  { %379 = vmatprep.subr.mxu1 %v123_v6  ;;  %325 = vmatprep.subr.mxu0 %v106_v5  ;;  %v121_v11 = vld [vmem:[#allocation7 + $0x160] sm:$0xff]  ;;  %v120_v14 = vld [vmem:[#allocation7 + $0x158] sm:$0xff]  ;;  %v87_v16 = vld [vmem:[#allocation7 + $0x50] sm:$0xff] }
  0x2b   :  { %380 = vmatpush3.msra.mxu1 %v123_v6  ;;  %326 = vmatpush3.msra.mxu0 %v90_v7  ;;  %v119_v17 = vld [vmem:[#allocation7 + $0x150] sm:$0xff]  ;;  %v102_v18 = vld [vmem:[#allocation7 + $0xc8] sm:$0xff]  ;;  %v101_v21 = vld [vmem:[#allocation7 + $0xc0] sm:$0xff] }
  0x2c   :  { %381 = vmatprep.subr.mxu1 %v122_v8  ;;  %327 = vmatprep.subr.mxu0 %v105_v9  ;;  %v86_v19 = vld [vmem:[#allocation7 + $0x48] sm:$0xff]  ;;  %v85_v22 = vld [vmem:[#allocation7 + $0x40] sm:$0xff]  ;;  %v100_v24 = vld [vmem:[#allocation7 + $0xb8] sm:$0xff] }
  0x2d   :  { %382 = vmatpush3.msra.mxu1 %v122_v8  ;;  %328 = vmatpush3.msra.mxu0 %v89_v10  ;;  %v118_v20 = vld [vmem:[#allocation7 + $0x148] sm:$0xff]  ;;  %v117_v23 = vld [vmem:[#allocation7 + $0x140] sm:$0xff]  ;;  %v84_v25 = vld [vmem:[#allocation7 + $0x38] sm:$0xff] }
  0x2e   :  { %383 = vmatprep.subr.mxu1 %v121_v11  ;;  %329 = vmatprep.subr.mxu0 %v104_v12  ;;  %v116_v26 = vld [vmem:[#allocation7 + $0x138] sm:$0xff]  ;;  %v99_v27 = vld [vmem:[#allocation7 + $0xb0] sm:$0xff]  ;;  %v98_v30 = vld [vmem:[#allocation7 + $0xa8] sm:$0xff] }
  0x2f   :  { %384 = vmatpush3.msra.mxu1 %v121_v11  ;;  %330 = vmatpush3.msra.mxu0 %v88_v13  ;;  %v83_v28 = vld [vmem:[#allocation7 + $0x30] sm:$0xff]  ;;  %v82_v31 = vld [vmem:[#allocation7 + $0x28] sm:$0xff]  ;;  %v97_v33 = vld [vmem:[#allocation7 + $0xa0] sm:$0xff] }
  0x30   :  { %385 = vmatprep.subr.mxu1 %v120_v14  ;;  %331 = vmatprep.subr.mxu0 %v103_v15  ;;  %v115_v29 = vld [vmem:[#allocation7 + $0x130] sm:$0xff]  ;;  %v114_v32 = vld [vmem:[#allocation7 + $0x128] sm:$0xff]  ;;  %v81_v34 = vld [vmem:[#allocation7 + $0x20] sm:$0xff] }
  0x31   :  { %386 = vmatpush3.msra.mxu1 %v120_v14  ;;  %332 = vmatpush3.msra.mxu0 %v87_v16  ;;  %v113_v35 = vld [vmem:[#allocation7 + $0x120] sm:$0xff]  ;;  %v96_v36 = vld [vmem:[#allocation7 + $0x98] sm:$0xff]  ;;  %v95_v39 = vld [vmem:[#allocation7 + $0x90] sm:$0xff] }
  0x32   :  { %387 = vmatprep.subr.mxu1 %v119_v17  ;;  %333 = vmatprep.subr.mxu0 %v102_v18  ;;  %v80_v37 = vld [vmem:[#allocation7 + $0x18] sm:$0xff]  ;;  %v79_v40 = vld [vmem:[#allocation7 + $0x10] sm:$0xff]  ;;  %v60_v42 = vld [vmem:[#allocation2 + $0x8] sm:$0xff] }
  0x33   :  { %388 = vmatpush3.msra.mxu1 %v119_v17  ;;  %334 = vmatpush3.msra.mxu0 %v86_v19  ;;  %v112_v38 = vld [vmem:[#allocation7 + $0x118] sm:$0xff]  ;;  %v111_v41 = vld [vmem:[#allocation7 + $0x110] sm:$0xff]  ;;  %v94_v43 = vld [vmem:[#allocation7 + $0x88] sm:$0xff]  ;;  %v72_v49 = vrot.slane %v60_v42, 1  ;;  %v65_v53 = vrot.slane %v60_v42, 7 }
  0x34   :  { %389 = vmatprep.subr.mxu1 %v118_v20  ;;  %335 = vmatprep.subr.mxu0 %v101_v21  ;;  %v59_v44 = vld [vmem:[#allocation2] sm:$0xff]  ;;  %v78_v45 = vld [vmem:[#allocation7 + $0x8] sm:$0xff]  ;;  %vm318_vm2 = vmneg %vm63_vm0 }
  0x35   :  { %390 = vmatpush3.msra.mxu1 %v118_v20  ;;  %336 = vmatpush3.msra.mxu0 %v85_v22  ;;  %v93_v46 = vld [vmem:[#allocation7 + $0x80] sm:$0xff]  ;;  %v71_v47 = vrot.slane %v59_v44, 1  ;;  %v110_v48 = vld [vmem:[#allocation7 + $0x108] sm:$0xff]  ;;  %v64_v51 = vrot.slane %v59_v44, 7  ;;  %v282_v3 = vld [vmem:[#allocation5] sm:$0xff] }
  0x36   :  { %391 = vmatprep.subr.mxu1 %v117_v23  ;;  %337 = vmatprep.subr.mxu0 %v100_v24  ;;  %v77_v50 = vld [vmem:[#allocation7] sm:$0xff]  ;;  %v283_v5 = vld [vmem:[#allocation5 + $0x8] sm:$0xff] }
  0x37   :  { %392 = vmatpush3.msra.mxu1 %v117_v23  ;;  %338 = vmatpush3.msra.mxu0 %v84_v25  ;;  %v109_v52 = vld [vmem:[#allocation7 + $0x100] sm:$0xff]  ;;  %v73_v54 = vsel %vm70_vm1, %v71_v47, %v72_v49  ;;  %v66_v55 = vsel %vm63_vm0, %v64_v51, %v65_v53 }
  0x38   :  { %393 = vmatprep.subr.mxu1 %v116_v26  ;;  %339 = vmatprep.subr.mxu0 %v99_v27  ;;  %v317_v58 = vld [vmem:[%s559_s3] ss:$0 sm:$0xff]  ;;  %s511_s3 = smov [#allocation8]  }
  0x39   :  { %394 = vmatpush3.msra.mxu1 %v116_v26  ;;  %340 = vmatpush3.msra.mxu0 %v83_v28  ;;  %s307_s5 = sshll.u32 %s511_s3, 4  ;;  %s308_s5 = int_to_ptr.vmem [resolvable:$true] %s307_s5 }
  0x3a   :  { %395 = vmatprep.subr.mxu1 %v115_v29  ;;  %341 = vmatprep.subr.mxu0 %v98_v30  ;;  %s480_s7 = scalar_lea.vmem %s308_s5, 16  ;;  %s484_s8 = scalar_lea.vmem %s308_s5, 32 }
  0x3b   :  { %396 = vmatpush3.msra.mxu1 %v115_v29  ;;  %342 = vmatpush3.msra.mxu0 %v82_v31  ;;  %p481_p1 = scmp.ne.s32.totalorder %s308_s5, %s480_s7  ;;  %p485_p2 = scmp.lt.s32.totalorder %s308_s5, %s308_s5 }
  0x3c   :  { %397 = vmatprep.subr.mxu1 %v114_v32  ;;  %343 = vmatprep.subr.mxu0 %v97_v33  ;;  %p486_p3 = scmp.lt.s32.totalorder %s484_s8, %s480_s7 }
  0x3d   :  { %398 = vmatpush3.msra.mxu1 %v114_v32  ;;  %344 = vmatpush3.msra.mxu0 %v81_v34 }
  0x3e   :  { %399 = vmatprep.subr.mxu1 %v113_v35  ;;  %345 = vmatprep.subr.mxu0 %v96_v36  ;;  %p487_p4 = por %p486_p3, %p485_p2 }
  0x3f   :  { %400 = vmatpush3.msra.mxu1 %v113_v35  ;;  %346 = vmatpush3.msra.mxu0 %v80_v37 }
  0x40   :  { %401 = vmatprep.subr.mxu1 %v112_v38  ;;  %347 = vmatprep.subr.mxu0 %v95_v39  ;;  %p488_p5 = pnand %p487_p4, %p481_p1 }
  0x41   :  { %402 = vmatpush3.msra.mxu1 %v112_v38  ;;  %348 = vmatpush3.msra.mxu0 %v79_v40 }
  0x42   :  { %403 = vmatprep.subr.mxu1 %v111_v41  ;;  %349 = vmatprep.subr.mxu0 %v94_v43 }
  0x43   :  { %196 = vmatprep.mubr.f32.mxu0 %v59_v44  ;;  %350 = vmatpush3.msra.mxu0 %v78_v45 }
  0x44   :  { %404 = vmatpush3.msra.mxu1 %v111_v41  ;;  %351 = vmatprep.subr.mxu0 %v93_v46 }
  0x45   :  { %405 = vmatprep.subr.mxu1 %v110_v48  ;;  %352 = vmatpush3.msra.mxu0 %v77_v50 }
  0x46   :  { %406 = vmatpush3.msra.mxu1 %v110_v48  ;;  %319 = vmatmul.mubr.msk.f32.vlgmr.msra.gmra.mxu0 %vm318_vm2, %v64_v51 }
  0x47   :  { %407 = vmatprep.subr.mxu1 %v109_v52  ;;  %201 = vmatprep.mubr.f32.mxu0 %v60_v42 }
  0x48   :  { %408 = vmatpush3.msra.mxu1 %v109_v52  ;;  %409 = vmatprep.mubr.f32.mxu1 %v73_v54 }
  0x49   :  { %410 = vmatmul.mubr.msk.f32.vlgmr.msra.gmra.mxu1 %vm70_vm1, %v72_v49 }
  0x4a   :  { %202 = vmatmul.mubr.f32.gmra.mxu0 %v66_v55 }
 0x106   :  { %v353_v56 = vpop.f32.mrf.mxu0 }
 0x108   :  { %v354_v57 = vpop.f32.mrf.mxu0 }
 0x109   :  { %v355_v59 = vadd.f32 %v354_v57, %v353_v56  ;;  %v411_v60 = vpop.f32.mrf.mxu1 }
 0x10a   :  { %v356_v61 = vpop.f32.mrf.mxu0 }
 0x10b   :  { %v199_v62 = vadd.f32 %v355_v59, %v317_v58  ;;  %v273_v63 = vpop.f32.mrf.mxu1 }
 0x10c   :  { %v357_v0 = vpop.f32.mrf.mxu0 }
 0x10d   :  { %v358_v1 = vadd.f32 %v357_v0, %v356_v61  ;;  %v274_v2 = vadd.f32 %v273_v63, %v199_v62 }
 0x10f   :  { %v204_v4 = vadd.f32 %v358_v1, %v317_v58  ;;  %v284_v7 = vsub.f32 %v274_v2, %v282_v3 }
 0x111   :  { %v279_v6 = vadd.f32 %v411_v60, %v204_v4  ;;  %v286_v9 = vmul.f32 %v284_v7, %v284_v7 }
 0x113   :  { %v285_v8 = vsub.f32 %v279_v6, %v283_v5 }
 0x115   :  { %v287_v10 = vmul.f32 %v285_v8, %v285_v8 }
 0x117   :  { %v288_v11 = vadd.f32 %v287_v10, %v286_v9 }
 0x119   :  { %289 = vadd.xlane.f32.xlu0 %v288_v11 }
 0x1a2   :  { %v290_v12 = vpop.xlane.xlu0 %289 }
 0x1a3   :  { %v291_v13 = vrot.slane %v290_v12, 4 }
 0x1a5   :  { %v292_v14 = vadd.f32 %v291_v13, %v290_v12 }
 0x1a7   :  { %v293_v15 = vrot.slane %v292_v14, 2 }
 0x1a9   :  { %v294_v16 = vadd.f32 %v293_v15, %v292_v14 }
 0x1ab   :  { %v295_v17 = vrot.slane %v294_v16, 1 }
 0x1ad   :  { %v296_v18 = vadd.f32 %v295_v17, %v294_v16 }
 0x1af   :  { %412 = vpush %v296_v18 }
 0x1e0   :  { %s413_s6 = spop %412 }
 0x1e1   :  { %v298_v19 = vstv %s413_s6 }
 0x1e2   :  { %300 = vst.msk [vmem:[#allocation8] sm:$0x1] %vm299_vm3, %v298_v19 }
 0x1e3   :  { %491 = shalt.err (!%p488_p5)
}
 0x1e4   :  { %310 = dma.vmem_to_hbm [thread:$0]  %s308_s5, 16, %s560_s4, [#allocation4]  }
 0x1e5   :  { %504 = dma.done.wait [#allocation4], 16  }
 0x1e6   :  { %505 = vsyncadd [#allocation4], 4294967280 }
 0x1e7   :  { %314 = vsyncpa [#allocation3], 1 }
 0x1e8   :  { %315 = vsyncpa [#allocation6], 1 }
 0x1e9   :  { %316 = vsyncpa [#allocation4], 1 }

</bundles_post_ra>
